<compile_context>
chip_gen: v5e
topology: v5e:2x2
jax: 0.10.0
libtpu: 0.0.40
codegen_flags: <defaults>
</compile_context>

<pallas_src>
import functools

import jax
import jax.numpy as jnp
from jax.experimental import pallas as pl
from jax.experimental.pallas import tpu as pltpu


D_IN, D_H1, D_H2, D_OUT = 100, 128, 64, 4
D_OUT_PAD = 8          # last-layer lane pad; only cols 0:4 are meaningful
MAX_TB = 2048          # batch tile cap


def _round_up(v, m):
    return ((v + m - 1) // m) * m


@functools.lru_cache(maxsize=1)
def _num_tensorcores():
    """v7x has 2 TensorCores/chip sharing 'parallel' grid axes; v5e/v6e have 1."""
    try:
        kind = jax.devices()[0].device_kind.lower()
        if "v7" in kind or "7x" in kind:
            return 2
    except Exception:
        pass
    return 1


def _mlp_kernel(x_ref, w1_ref, b1_ref, w2_ref, b2_ref, w3_ref, b3_ref, o_ref):
    x = x_ref[...]

    h1 = jnp.dot(x, w1_ref[...], preferred_element_type=jnp.float32) + b1_ref[...]
    h1 = jnp.maximum(h1, 0.0)

    h2 = jnp.dot(h1, w2_ref[...], preferred_element_type=jnp.float32) + b2_ref[...]
    h2 = jnp.maximum(h2, 0.0)

    out = jnp.dot(h2, w3_ref[...], preferred_element_type=jnp.float32) + b3_ref[...]
    o_ref[...] = out.astype(o_ref.dtype)


def pad_output_layer(w3, b3):
    """Pad the last layer from 4 to D_OUT_PAD columns. Call ONCE, outside jit."""
    w3p = jnp.pad(w3.astype(jnp.float32), ((0, 0), (0, D_OUT_PAD - D_OUT)))
    b3p = jnp.pad(b3.astype(jnp.float32), ((0, 0), (0, D_OUT_PAD - D_OUT)))
    return w3p, b3p


@jax.jit
def ode_param_regressor(x, w1, b1, w2, b2, w3p, b3p):
    """x: [B, 100] float32 -> theta: [B, 4] float32.

    w3p/b3p must already be padded to D_OUT_PAD columns (pad_output_layer)."""
    B = x.shape[0]

    # Batch tile: large enough to amortize per-grid-step overhead and fill the
    # MXU M dim; split so each TensorCore gets at least one block; multiple of
    # 8 (sublane alignment).  All of this is Python-level (static shapes).
    num_tc = _num_tensorcores()
    tb = min(MAX_TB, max(8, _round_up(pl.cdiv(B, num_tc), 8)))
    num_blocks = pl.cdiv(B, tb)
    b_pad = num_blocks * tb

    flops = 2 * b_pad * (D_IN * D_H1 + D_H1 * D_H2 + D_H2 * D_OUT_PAD)
    bytes_accessed = (
        B * D_IN * 4                                         # x streamed in
        + (D_IN * D_H1 + D_H1                                # W1, b1
           + D_H1 * D_H2 + D_H2                              # W2, b2
           + D_H2 * D_OUT_PAD + D_OUT_PAD) * 4               # W3p, b3p
        + b_pad * D_OUT_PAD * 4                              # output writeback
    )

    out = pl.pallas_call(
        _mlp_kernel,
        out_shape=jax.ShapeDtypeStruct((b_pad, D_OUT_PAD), jnp.float32),
        grid_spec=pltpu.PrefetchScalarGridSpec(
            num_scalar_prefetch=0,
            grid=(num_blocks,),
            in_specs=[
                pl.BlockSpec((tb, D_IN), lambda i: (i, 0)),           # x tile
                pl.BlockSpec((D_IN, D_H1), lambda i: (0, 0)),         # W1 (resident)
                pl.BlockSpec((1, D_H1), lambda i: (0, 0)),            # b1
                pl.BlockSpec((D_H1, D_H2), lambda i: (0, 0)),         # W2
                pl.BlockSpec((1, D_H2), lambda i: (0, 0)),            # b2
                pl.BlockSpec((D_H2, D_OUT_PAD), lambda i: (0, 0)),    # W3 (8-wide)
                pl.BlockSpec((1, D_OUT_PAD), lambda i: (0, 0)),       # b3 (8-wide)
            ],
            out_specs=pl.BlockSpec((tb, D_OUT_PAD), lambda i: (i, 0)),
        ),
        compiler_params=pltpu.CompilerParams(
            dimension_semantics=("parallel",),
        ),
        cost_estimate=pl.CostEstimate(
            flops=flops, transcendentals=0, bytes_accessed=bytes_accessed),
    )(x, w1, b1, w2, b2, w3p, b3p)

    # Overhang rows of the ragged last block and padded output lanes are
    # garbage; drop them.
    return out[:B, :D_OUT]


def init_params(key):
    """Deterministic init mimicking PyTorch nn.Linear default
    (U[-1/sqrt(fan_in), +1/sqrt(fan_in)]).  Weights are [in, out] (PyTorch W.T)."""
    ks = jax.random.split(key, 6)

    def linear(kw, kb, fan_in, fan_out):
        bound = 1.0 / jnp.sqrt(jnp.float32(fan_in))
        w = jax.random.uniform(kw, (fan_in, fan_out), jnp.float32, -bound, bound)
        b = jax.random.uniform(kb, (1, fan_out), jnp.float32, -bound, bound)
        return w, b

    w1, b1 = linear(ks[0], ks[1], D_IN, D_H1)
    w2, b2 = linear(ks[2], ks[3], D_H1, D_H2)
    w3, b3 = linear(ks[4], ks[5], D_H2, D_OUT)
    return w1, b1, w2, b2, w3, b3


def _reference(x, w1, b1, w2, b2, w3, b3):
    h1 = jnp.maximum(x @ w1 + b1, 0.0)
    h2 = jnp.maximum(h1 @ w2 + b2, 0.0)
    return h2 @ w3 + b3


if __name__ == "__main__":
    key = jax.random.PRNGKey(0)
    k_x, k_p = jax.random.split(key)

    batch = 2
    x = jax.random.normal(k_x, (batch, D_IN), jnp.float32)
    w1, b1, w2, b2, w3, b3 = init_params(k_p)
    w3p, b3p = pad_output_layer(w3, b3)   # hoisted: padded once, outside jit

    theta = jax.block_until_ready(ode_param_regressor(x, w1, b1, w2, b2, w3p, b3p))
    ref = _reference(x, w1, b1, w2, b2, w3, b3)
    assert theta.shape == (batch, D_OUT), theta.shape
    assert jnp.allclose(theta, ref, atol=1e-5, rtol=1e-5), "mismatch vs JAX reference"

    # Non-multiple-of-tile larger batch exercises the ragged final block and
    # the multi-block (per-TensorCore) path.
    x_big = jax.random.normal(k_x, (1000, D_IN), jnp.float32)
    theta_big = jax.block_until_ready(
        ode_param_regressor(x_big, w1, b1, w2, b2, w3p, b3p))
    ref_big = _reference(x_big, w1, b1, w2, b2, w3, b3)
    assert theta_big.shape == (1000, D_OUT)
    assert jnp.allclose(theta_big, ref_big, atol=1e-4, rtol=1e-4), "mismatch (big batch)"

    print("KERNEL_OK")
</pallas_src>

<mosaic_0001>
module attributes {stable_mosaic.version = 11 : i64} {
  func.func @_mlp_kernel(%arg0: i32, %arg1: memref<8x100xf32, #tpu.memory_space<vmem>>, %arg2: memref<100x128xf32, #tpu.memory_space<vmem>>, %arg3: memref<1x128xf32, #tpu.memory_space<vmem>>, %arg4: memref<128x64xf32, #tpu.memory_space<vmem>>, %arg5: memref<1x64xf32, #tpu.memory_space<vmem>>, %arg6: memref<64x8xf32, #tpu.memory_space<vmem>>, %arg7: memref<1x8xf32, #tpu.memory_space<vmem>>, %arg8: memref<8x8xf32, #tpu.memory_space<vmem>>) attributes {dimension_semantics = [#tpu.dimension_semantics<parallel>], iteration_bounds = array<i64: 1>, scalar_prefetch = 0 : i64, scratch_operands = 0 : i64, tpu.core_type = #tpu.core_type<tc>, window_params = [{transform_indices = @transform_0, window_bounds = array<i64: 8, 100>}, {pipeline_mode = #tpu.pipeline_mode<synchronous>, transform_indices = @transform_1, window_bounds = array<i64: 100, 128>}, {pipeline_mode = #tpu.pipeline_mode<synchronous>, transform_indices = @transform_2, window_bounds = array<i64: 1, 128>}, {pipeline_mode = #tpu.pipeline_mode<synchronous>, transform_indices = @transform_3, window_bounds = array<i64: 128, 64>}, {pipeline_mode = #tpu.pipeline_mode<synchronous>, transform_indices = @transform_4, window_bounds = array<i64: 1, 64>}, {pipeline_mode = #tpu.pipeline_mode<synchronous>, transform_indices = @transform_5, window_bounds = array<i64: 64, 8>}, {pipeline_mode = #tpu.pipeline_mode<synchronous>, transform_indices = @transform_6, window_bounds = array<i64: 1, 8>}, {transform_indices = @transform_7, window_bounds = array<i64: 8, 8>}]} {
    %c0 = arith.constant 0 : index
    %c0_0 = arith.constant 0 : index
    %0 = vector.load %arg1[%c0, %c0_0] : memref<8x100xf32, #tpu.memory_space<vmem>>, vector<8x100xf32>
    %c0_1 = arith.constant 0 : index
    %c0_2 = arith.constant 0 : index
    %1 = vector.load %arg2[%c0_1, %c0_2] : memref<100x128xf32, #tpu.memory_space<vmem>>, vector<100x128xf32>
    %cst = arith.constant dense<0.000000e+00> : vector<8x128xf32>
    %2 = tpu.matmul %0, %1, %cst {dimension_numbers = #tpu.dot_dimension_numbers<[1], [0], [0], [1], [0, 0, 1, 1], [], []>} : vector<8x100xf32>, vector<100x128xf32>, vector<8x128xf32> -> vector<8x128xf32>
    %c0_3 = arith.constant 0 : index
    %c0_4 = arith.constant 0 : index
    %3 = vector.load %arg3[%c0_3, %c0_4] : memref<1x128xf32, #tpu.memory_space<vmem>>, vector<1x128xf32>
    %4 = vector.broadcast %3 : vector<1x128xf32> to vector<8x128xf32>
    %5 = arith.addf %2, %4 : vector<8x128xf32>
    %cst_5 = arith.constant 0.000000e+00 : f32
    %6 = vector.broadcast %cst_5 : f32 to vector<8x128xf32>
    %7 = arith.maximumf %5, %6 : vector<8x128xf32>
    %c0_6 = arith.constant 0 : index
    %c0_7 = arith.constant 0 : index
    %8 = vector.load %arg4[%c0_6, %c0_7] : memref<128x64xf32, #tpu.memory_space<vmem>>, vector<128x64xf32>
    %cst_8 = arith.constant dense<0.000000e+00> : vector<8x64xf32>
    %9 = tpu.matmul %7, %8, %cst_8 {dimension_numbers = #tpu.dot_dimension_numbers<[1], [0], [0], [1], [0, 0, 1, 1], [], []>} : vector<8x128xf32>, vector<128x64xf32>, vector<8x64xf32> -> vector<8x64xf32>
    %c0_9 = arith.constant 0 : index
    %c0_10 = arith.constant 0 : index
    %10 = vector.load %arg5[%c0_9, %c0_10] : memref<1x64xf32, #tpu.memory_space<vmem>>, vector<1x64xf32>
    %11 = vector.broadcast %10 : vector<1x64xf32> to vector<8x64xf32>
    %12 = arith.addf %9, %11 : vector<8x64xf32>
    %cst_11 = arith.constant 0.000000e+00 : f32
    %13 = vector.broadcast %cst_11 : f32 to vector<8x64xf32>
    %14 = arith.maximumf %12, %13 : vector<8x64xf32>
    %c0_12 = arith.constant 0 : index
    %c0_13 = arith.constant 0 : index
    %15 = vector.load %arg6[%c0_12, %c0_13] : memref<64x8xf32, #tpu.memory_space<vmem>>, vector<64x8xf32>
    %cst_14 = arith.constant dense<0.000000e+00> : vector<8x8xf32>
    %16 = tpu.matmul %14, %15, %cst_14 {dimension_numbers = #tpu.dot_dimension_numbers<[1], [0], [0], [1], [0, 0, 1, 1], [], []>} : vector<8x64xf32>, vector<64x8xf32>, vector<8x8xf32> -> vector<8x8xf32>
    %c0_15 = arith.constant 0 : index
    %c0_16 = arith.constant 0 : index
    %17 = vector.load %arg7[%c0_15, %c0_16] : memref<1x8xf32, #tpu.memory_space<vmem>>, vector<1x8xf32>
    %18 = vector.broadcast %17 : vector<1x8xf32> to vector<8x8xf32>
    %19 = arith.addf %16, %18 : vector<8x8xf32>
    %c0_17 = arith.constant 0 : index
    %c0_18 = arith.constant 0 : index
    %20 = vector.load %arg8[%c0_17, %c0_18] : memref<8x8xf32, #tpu.memory_space<vmem>>, vector<8x8xf32>
    tpu.vector_store %arg8[%c0_17, %c0_18], %19 {strides = array<i32>} : memref<8x8xf32, #tpu.memory_space<vmem>>, vector<8x8xf32>,
    return
  }
  func.func @transform_0(%arg0: i32) -> (i32, i32) {
    %c0_i32 = arith.constant 0 : i32
    %c0_i32_0 = arith.constant 0 : i32
    return %arg0, %c0_i32 : i32, i32
  }
  func.func @transform_1(%arg0: i32) -> (i32, i32) {
    %c0_i32 = arith.constant 0 : i32
    %c0_i32_0 = arith.constant 0 : i32
    %c0_i32_1 = arith.constant 0 : i32
    return %c0_i32, %c0_i32_0 : i32, i32
  }
  func.func @transform_2(%arg0: i32) -> (i32, i32) {
    %c0_i32 = arith.constant 0 : i32
    %c0_i32_0 = arith.constant 0 : i32
    %c0_i32_1 = arith.constant 0 : i32
    return %c0_i32, %c0_i32_0 : i32, i32
  }
  func.func @transform_3(%arg0: i32) -> (i32, i32) {
    %c0_i32 = arith.constant 0 : i32
    %c0_i32_0 = arith.constant 0 : i32
    %c0_i32_1 = arith.constant 0 : i32
    return %c0_i32, %c0_i32_0 : i32, i32
  }
  func.func @transform_4(%arg0: i32) -> (i32, i32) {
    %c0_i32 = arith.constant 0 : i32
    %c0_i32_0 = arith.constant 0 : i32
    %c0_i32_1 = arith.constant 0 : i32
    return %c0_i32, %c0_i32_0 : i32, i32
  }
  func.func @transform_5(%arg0: i32) -> (i32, i32) {
    %c0_i32 = arith.constant 0 : i32
    %c0_i32_0 = arith.constant 0 : i32
    %c0_i32_1 = arith.constant 0 : i32
    return %c0_i32, %c0_i32_0 : i32, i32
  }
  func.func @transform_6(%arg0: i32) -> (i32, i32) {
    %c0_i32 = arith.constant 0 : i32
    %c0_i32_0 = arith.constant 0 : i32
    %c0_i32_1 = arith.constant 0 : i32
    return %c0_i32, %c0_i32_0 : i32, i32
  }
  func.func @transform_7(%arg0: i32) -> (i32, i32) {
    %c0_i32 = arith.constant 0 : i32
    %c0_i32_0 = arith.constant 0 : i32
    return %arg0, %c0_i32 : i32, i32
  }
}

</mosaic_0001>

<bundles_post_ra>
// kernel: ode_param_regressor.1
= control target key start
LH: loop header
LB: loop body
LE: loop exit
PB: predicated region body
PF: predicated region fallthrough
CT: control target
= control target key end

     0   :  { %vm48_vm0 = vcmask 1043456   ;;  %vm44_vm1 = vcmask 818176   ;;  %vm126_vm2 = vcmask 523264   ;;  %vm150_vm3 = vcmask 64512   ;;  %s328_s1 = inlined_call_operand.vmem [shape: f32[100,128], index: 1, kind: input, shape index: {}]   ;;  %s329_s3 = inlined_call_operand.vmem [shape: f32[128,64], index: 3, kind: input, shape index: {}]   ;;  %s330_s2 = inlined_call_operand.vmem [shape: f32[1,128], index: 2, kind: input, shape index: {}]   ;;  %s331_s0 = inlined_call_operand.vmem [shape: f32[2,100], index: 0, kind: input, shape index: {}]   ;;  %s332_s4 = inlined_call_operand.vmem [shape: f32[1,64], index: 4, kind: input, shape index: {}]   ;;  %s333_s5 = inlined_call_operand.vmem [shape: f32[64,8], index: 5, kind: input, shape index: {}]   ;;  %s334_s6 = inlined_call_operand.vmem [shape: f32[1,8], index: 6, kind: input, shape index: {}]   ;;  %s335_s7 = inlined_call_operand.vmem [shape: f32[8,8], index: 7, kind: output, shape index: {}]  }
   0x1   :  { %v39_v0 = vld [vmem:[%s328_s1 + $0x60] sm:$0xf]  ;;  %v38_v1 = vld [vmem:[%s328_s1 + $0x58] sm:$0xff]  ;;  %v37_v2 = vld [vmem:[%s328_s1 + $0x50] sm:$0xff] }
   0x2   :  { %156 = vmatpush.msk.msra.mxu0 %vm48_vm0, %v39_v0  ;;  %v36_v3 = vld [vmem:[%s328_s1 + $0x48] sm:$0xff]  ;;  %v88_v4 = vld [vmem:[%s329_s3 + $0x78] sm:$0xff]  ;;  %v87_v5 = vld [vmem:[%s329_s3 + $0x70] sm:$0xff] }
   0x3   :  { %93 = vmatpush.msra.mxu1 %v88_v4  ;;  %v35_v6 = vld [vmem:[%s328_s1 + $0x40] sm:$0xff]  ;;  %v86_v7 = vld [vmem:[%s329_s3 + $0x68] sm:$0xff]  ;;  %v34_v8 = vld [vmem:[%s328_s1 + $0x38] sm:$0xff] }
   0x4   :  { %56 = vmatpush.msra.mxu0 %v38_v1  ;;  %v85_v9 = vld [vmem:[%s329_s3 + $0x60] sm:$0xff]  ;;  %v33_v10 = vld [vmem:[%s328_s1 + $0x30] sm:$0xff]  ;;  %v84_v11 = vld [vmem:[%s329_s3 + $0x58] sm:$0xff] }
   0x5   :  { %94 = vmatpush.msra.mxu1 %v87_v5  ;;  %v32_v12 = vld [vmem:[%s328_s1 + $0x28] sm:$0xff]  ;;  %v83_v13 = vld [vmem:[%s329_s3 + $0x50] sm:$0xff]  ;;  %v31_v14 = vld [vmem:[%s328_s1 + $0x20] sm:$0xff] }
   0x6   :  { %57 = vmatpush.msra.mxu0 %v37_v2  ;;  %v82_v15 = vld [vmem:[%s329_s3 + $0x48] sm:$0xff]  ;;  %v30_v16 = vld [vmem:[%s328_s1 + $0x18] sm:$0xff]  ;;  %v81_v17 = vld [vmem:[%s329_s3 + $0x40] sm:$0xff] }
   0x7   :  { %95 = vmatpush.msra.mxu1 %v86_v7  ;;  %v29_v18 = vld [vmem:[%s328_s1 + $0x10] sm:$0xff]  ;;  %v80_v19 = vld [vmem:[%s329_s3 + $0x38] sm:$0xff]  ;;  %v28_v20 = vld [vmem:[%s328_s1 + $0x8] sm:$0xff] }
   0x8   :  { %58 = vmatpush.msra.mxu0 %v36_v3  ;;  %v79_v21 = vld [vmem:[%s329_s3 + $0x30] sm:$0xff]  ;;  %v27_v22 = vld [vmem:[%s328_s1] sm:$0xff]  ;;  %v78_v23 = vld [vmem:[%s329_s3 + $0x28] sm:$0xff] }
   0x9   :  { %96 = vmatpush.msra.mxu1 %v85_v9  ;;  %v26_v24 = vld [vmem:[%s331_s0] sm:$0xff]  ;;  %v76_v26 = vld [vmem:[%s329_s3 + $0x18] sm:$0xff]  ;;  %v75_v27 = vld [vmem:[%s329_s3 + $0x10] sm:$0xff] }
   0xa   :  { %59 = vmatpush.msra.mxu0 %v35_v6  ;;  %v77_v25 = vld [vmem:[%s329_s3 + $0x20] sm:$0xff]  ;;  %v74_v28 = vld [vmem:[%s329_s3 + $0x8] sm:$0xff]  ;;  %v121_v30 = vld [vmem:[%s333_s5 + $0x38] sm:$0xff] }
   0xb   :  { %97 = vmatpush.msra.mxu1 %v84_v11  ;;  %v73_v29 = vld [vmem:[%s329_s3] sm:$0xff]  ;;  %v120_v31 = vld [vmem:[%s333_s5 + $0x30] sm:$0xff]  ;;  %138 = vmatpush.msra.mxu2 %v121_v30  ;;  %v119_v32 = vld [vmem:[%s333_s5 + $0x28] sm:$0xff] }
   0xc   :  { %60 = vmatpush.msra.mxu0 %v34_v8  ;;  %v118_v33 = vld [vmem:[%s333_s5 + $0x20] sm:$0xff]  ;;  %v117_v34 = vld [vmem:[%s333_s5 + $0x18] sm:$0xff]  ;;  %v116_v39 = vld [vmem:[%s333_s5 + $0x10] sm:$0xff] }
   0xd   :  { %98 = vmatpush.msra.mxu1 %v83_v13  ;;  %139 = vmatpush.msra.mxu2 %v120_v31  ;;  %v159_v35 = vld [vmem:[%s330_s2] ss:$0 sm:$0xff]  ;;  %v115_v40 = vld [vmem:[%s333_s5 + $0x8] sm:$0xff] }
   0xe   :  { %61 = vmatpush.msra.mxu0 %v33_v10  ;;  %v114_v41 = vld [vmem:[%s333_s5] sm:$0xff] }
   0xf   :  { %99 = vmatpush.msra.mxu1 %v82_v15  ;;  %140 = vmatpush.msra.mxu2 %v119_v32  ;;  %v160_v42 = vld [vmem:[%s332_s4] ss:$0 sm:$0xff] }
  0x10   :  { %62 = vmatpush.msra.mxu0 %v32_v12  ;;  %v161_v46 = vld [vmem:[%s334_s6] ss:$0 sm:$0xff] }
  0x11   :  { %100 = vmatpush.msra.mxu1 %v81_v17  ;;  %141 = vmatpush.msra.mxu2 %v118_v33 }
  0x12   :  { %63 = vmatpush.msra.mxu0 %v31_v14 }
  0x13   :  { %101 = vmatpush.msra.mxu1 %v80_v19  ;;  %142 = vmatpush.msra.mxu2 %v117_v34 }
  0x14   :  { %64 = vmatpush.msra.mxu0 %v30_v16 }
  0x15   :  { %102 = vmatpush.msra.mxu1 %v79_v21  ;;  %143 = vmatpush.msra.mxu2 %v116_v39 }
  0x16   :  { %65 = vmatpush.msra.mxu0 %v29_v18 }
  0x17   :  { %103 = vmatpush.msra.mxu1 %v78_v23  ;;  %144 = vmatpush.msra.mxu2 %v115_v40 }
  0x18   :  { %66 = vmatpush.msra.mxu0 %v28_v20 }
  0x19   :  { %104 = vmatpush.msra.mxu1 %v77_v25  ;;  %145 = vmatpush.msra.mxu2 %v114_v41 }
  0x1a   :  { %67 = vmatpush.msra.mxu0 %v27_v22 }
  0x1b   :  { %157 = vmatmul.msk.f32.vlgmr.msra.gmra.mxu0 %vm44_vm1, %v26_v24  ;;  %105 = vmatpush.msra.mxu1 %v76_v26 }
  0x1d   :  { %106 = vmatpush.msra.mxu1 %v75_v27 }
  0x1f   :  { %107 = vmatpush.msra.mxu1 %v74_v28 }
  0x21   :  { %108 = vmatpush.msra.mxu1 %v73_v29 }
  0x98   :  { %v69_v36 = vpop.f32.mrf.mxu0 }
  0x99   :  { %v70_v37 = vadd.f32 %v159_v35, %v69_v36 }
  0x9b   :  { %v72_v38 = vmax.f32 %v70_v37, 0.0 }
  0x9d   :  { %109 = vmatmul.f32.vlgmr.msra.gmra.mxu1 %v72_v38 }
 0x11a   :  { %v110_v43 = vpop.f32.mrf.mxu1 }
 0x11b   :  { %v111_v44 = vadd.f32 %v160_v42, %v110_v43 }
 0x11d   :  { %v113_v45 = vmax.f32 %v111_v44, 0.0 }
 0x11f   :  { %158 = vmatmul.msk.f32.vlgmr.msra.gmra.mxu2 %vm126_vm2, %v113_v45 }
 0x1a2   :  { %v147_v47 = vpop.f32.mrf.mxu2 }
 0x1a3   :  { %v148_v48 = vadd.f32 %v161_v46, %v147_v47 }
 0x1a5   :  { %151 = vst.msk [vmem:[%s335_s7] sm:$0xff] %vm150_vm3, %v148_v48 }

</bundles_post_ra>
